<compile_context>
chip_gen: v7x
topology: tpu7x:2x2x1
jax: 0.10.0
libtpu: 0.0.40
codegen_flags: <defaults>
</compile_context>

<pallas_src>
import functools

import jax
import jax.numpy as jnp
from jax.experimental import pallas as pl
from jax.experimental.pallas import tpu as pltpu

LANE = 128
DEF_TILE = 1024                       # dst/src tile for large graphs
RESIDENT_XSRC_BYTES = 8 * 1024 * 1024  # keep x_src fully in VMEM below this
VMEM_LIMIT_BYTES = 48 * 1024 * 1024    # <= v7x 64 MiB physical; fine on v5e/v6e


def _round_up(x, m):
    return ((x + m - 1) // m) * m


def _choose_tiles(n):
    """Padded node count and (dst, src) tile sizes that divide it."""
    if n <= DEF_TILE:
        n_pad = _round_up(n, LANE)
        tile_src = n_pad
        # Keep >= 2 dst tiles when possible so both v7x TensorCores get work.
        tile_dst = n_pad // 2 if n_pad >= 2 * LANE else n_pad
    else:
        n_pad = _round_up(n, DEF_TILE)
        tile_src = DEF_TILE
        tile_dst = DEF_TILE
    return n_pad, tile_dst, tile_src


# ----------------------------- Pallas kernels -------------------------------
def _proj_kernel(x_ref, w_ref, o_ref):
    # Row-tiled X @ W (used when projecting before aggregation).
    o_ref[...] = jnp.dot(
        x_ref[...], w_ref[...], preferred_element_type=jnp.float32
    ).astype(o_ref.dtype)


def _project_rows(x, w, *, tile_rows):
    """out[rows, :] = (x @ w) as bf16, tiled over rows."""
    n_pad, f_in = x.shape
    f_out = w.shape[1]
    return pl.pallas_call(
        _proj_kernel,
        out_shape=jax.ShapeDtypeStruct((n_pad, f_out), jnp.bfloat16),
        grid=(n_pad // tile_rows,),
        in_specs=[
            pl.BlockSpec((tile_rows, f_in), lambda i: (i, 0)),
            pl.BlockSpec((f_in, f_out), lambda i: (0, 0)),
        ],
        out_specs=pl.BlockSpec((tile_rows, f_out), lambda i: (i, 0)),
        compiler_params=pltpu.CompilerParams(dimension_semantics=("parallel",)),
    )(x, w)


def _sage_kernel(adj_ref, deginv_ref, xsrc_ref, xdst_ref, *rest,
                 apply_wl, apply_relu, resident_src, tile_src):
    # rest = ([wl_ref,] wr_ref, b_ref, o_ref, acc_ref)
    if apply_wl:
        wl_ref, wr_ref, b_ref, o_ref, acc_ref = rest
    else:
        wl_ref = None
        wr_ref, b_ref, o_ref, acc_ref = rest

    k = pl.program_id(1)

    @pl.when(k == 0)
    def _init():
        acc_ref[...] = jnp.zeros_like(acc_ref)

    # Upcast adjacency edge counts (int8 / bf16 in HBM) to bf16 for the MXU.
    adj = adj_ref[...].astype(jnp.bfloat16)
    if resident_src:
        # x_src lives fully in VMEM; slice the reduction window out of it.
        start = pl.multiple_of(k * tile_src, tile_src)
        xs = xsrc_ref[pl.ds(start, tile_src), :]
    else:
        xs = xsrc_ref[...]

    # Accumulate (un-normalized) neighbor sum for this dst tile.
    acc_ref[...] += jnp.dot(adj, xs, preferred_element_type=jnp.float32)

    @pl.when(k == pl.num_programs(1) - 1)
    def _finalize():
        # Mean normalization in f32 (exact), post-aggregation.
        agg = acc_ref[...] * deginv_ref[...]
        if apply_wl:
            # Aggregate-then-project (used when F_out >= F_in).
            agg = jnp.dot(
                agg.astype(jnp.bfloat16), wl_ref[...],
                preferred_element_type=jnp.float32,
            )
        out = (
            agg
            + jnp.dot(xdst_ref[...], wr_ref[...], preferred_element_type=jnp.float32)
            + b_ref[...]
        )
        if apply_relu:
            out = jnp.maximum(out, 0.0)
        o_ref[...] = out.astype(o_ref.dtype)


def sage_layer(adj, deg_inv, x, w_l, w_r, b, *, apply_relu, out_dtype,
               tile_dst, tile_src):
    """One SAGEConv layer, tiled over (dst rows) x (src reduction)."""
    n_pad, f_in_p = x.shape
    f_out_p = w_l.shape[1]

    # Contract the O(N^2) adjacency matmul over the narrower padded width.
    proj_first = f_out_p < f_in_p
    if proj_first:
        x_src = _project_rows(x, w_l, tile_rows=tile_dst)  # bf16 [n_pad, f_out_p]
        c_width = f_out_p
    else:
        x_src = x                                          # bf16 [n_pad, f_in_p]
        c_width = f_in_p

    # Keep x_src fully VMEM-resident when small -> DMA'd exactly once/layer.
    resident_src = n_pad * c_width * 2 <= RESIDENT_XSRC_BYTES

    kernel = functools.partial(
        _sage_kernel,
        apply_wl=not proj_first,
        apply_relu=apply_relu,
        resident_src=resident_src,
        tile_src=tile_src,
    )

    if resident_src:
        xsrc_spec = pl.BlockSpec((n_pad, c_width), lambda i, k: (0, 0))
    else:
        xsrc_spec = pl.BlockSpec((tile_src, c_width), lambda i, k: (k, 0))

    in_specs = [
        pl.BlockSpec((tile_dst, tile_src), lambda i, k: (i, k)),   # adjacency counts
        pl.BlockSpec((tile_dst, 1), lambda i, k: (i, 0)),          # 1/deg
        xsrc_spec,                                                 # src features
        pl.BlockSpec((tile_dst, f_in_p), lambda i, k: (i, 0)),     # dst features (root)
    ]
    args = [adj, deg_inv, x_src, x]
    if not proj_first:
        in_specs.append(pl.BlockSpec((f_in_p, f_out_p), lambda i, k: (0, 0)))
        args.append(w_l)
    in_specs += [
        pl.BlockSpec((f_in_p, f_out_p), lambda i, k: (0, 0)),      # w_r
        pl.BlockSpec((1, f_out_p), lambda i, k: (0, 0)),           # bias
    ]
    args += [w_r, b]

    return pl.pallas_call(
        kernel,
        out_shape=jax.ShapeDtypeStruct((n_pad, f_out_p), out_dtype),
        grid=(n_pad // tile_dst, n_pad // tile_src),
        in_specs=in_specs,
        out_specs=pl.BlockSpec((tile_dst, f_out_p), lambda i, k: (i, 0)),
        scratch_shapes=[pltpu.VMEM((tile_dst, c_width), jnp.float32)],
        compiler_params=pltpu.CompilerParams(
            dimension_semantics=("parallel", "arbitrary"),
            vmem_limit_bytes=VMEM_LIMIT_BYTES,
        ),
    )(*args)


# ------------------------------ JAX glue -------------------------------------
def build_adjacency(edge_index, num_nodes, n_pad):
    """Dense edge-count matrix (int8/bf16) + per-row 1/deg (f32), padded to n_pad.

    counts[i, j] = number of edges j -> i (PyG mean counts duplicate edges).
    Isolated nodes get deg_inv = 0 (mean of an empty neighborhood -> 0).
    """
    # TODO(synk): for genuinely large/sparse graphs, replace this dense O(N^2)
    # adjacency with a CSR layout driven by PrefetchScalarGridSpec gathers.
    src = edge_index[0]
    dst = edge_index[1]
    counts = jnp.zeros((n_pad, n_pad), jnp.int32).at[dst, src].add(1)
    deg = counts.sum(axis=1, keepdims=True).astype(jnp.float32)
    deg_inv = jnp.where(deg > 0.0, 1.0 / jnp.maximum(deg, 1.0), 0.0)

    # Choose the narrowest exact HBM storage dtype for the counts (this script
    # runs the wrapper eagerly, so the concrete max is available here).
    max_mult = int(jax.device_get(counts.max()))
    if max_mult <= 127:
        adj = counts.astype(jnp.int8)        # 1 B/elem, exact
    else:
        adj = counts.astype(jnp.bfloat16)    # exact integers up to 256
    return adj, deg_inv.astype(jnp.float32)


def init_sage_params(key, in_channels, hidden_channels, out_channels):
    """Deterministic glorot-ish init for the two SAGEConv layers (f32)."""
    ks = jax.random.split(key, 4)

    def glorot(k, fan_in, fan_out):
        scale = jnp.sqrt(6.0 / (fan_in + fan_out))
        return jax.random.uniform(k, (fan_in, fan_out), jnp.float32, -scale, scale)

    return {
        "w_l1": glorot(ks[0], in_channels, hidden_channels),
        "w_r1": glorot(ks[1], in_channels, hidden_channels),
        "b1": jnp.zeros((1, hidden_channels), jnp.float32),
        "w_l2": glorot(ks[2], hidden_channels, out_channels),
        "w_r2": glorot(ks[3], hidden_channels, out_channels),
        "b2": jnp.zeros((1, out_channels), jnp.float32),
    }


def _prepare(params, x, edge_index):
    """Pad everything lane-dense (128-multiple); cast MXU operands to bf16."""
    n, c_in = x.shape
    c_hid = params["w_l1"].shape[1]
    c_out = params["w_l2"].shape[1]

    n_pad, tile_dst, tile_src = _choose_tiles(n)
    c_in_p = _round_up(c_in, LANE)
    c_hid_p = _round_up(c_hid, LANE)
    c_out_p = _round_up(c_out, LANE)

    adj, deg_inv = build_adjacency(edge_index, n, n_pad)

    x_p = jnp.zeros((n_pad, c_in_p), jnp.bfloat16).at[:n, :c_in].set(
        x.astype(jnp.bfloat16)
    )

    def pad_w(w, rows, cols):
        return jnp.zeros((rows, cols), jnp.bfloat16).at[
            : w.shape[0], : w.shape[1]
        ].set(w.astype(jnp.bfloat16))

    def pad_b(b, cols):
        return jnp.zeros((1, cols), jnp.float32).at[:, : b.shape[1]].set(b)

    pp = {
        "w_l1": pad_w(params["w_l1"], c_in_p, c_hid_p),
        "w_r1": pad_w(params["w_r1"], c_in_p, c_hid_p),
        "b1": pad_b(params["b1"], c_hid_p),
        "w_l2": pad_w(params["w_l2"], c_hid_p, c_out_p),
        "w_r2": pad_w(params["w_r2"], c_hid_p, c_out_p),
        "b2": pad_b(params["b2"], c_out_p),
    }
    meta = (n, c_out, tile_dst, tile_src)
    return adj, deg_inv, x_p, pp, meta


def sage_gen_forward(params, x, edge_index):
    """SAGE_gen.forward: conv1 -> ReLU -> conv2 (num_layers=2, BN/dropout unused)."""
    adj, deg_inv, x_p, pp, meta = _prepare(params, x, edge_index)
    n, c_out, tile_dst, tile_src = meta

    # Layer 1 emits bf16 directly (no f32 HBM round trip between layers).
    h = sage_layer(adj, deg_inv, x_p, pp["w_l1"], pp["w_r1"], pp["b1"],
                   apply_relu=True, out_dtype=jnp.bfloat16,
                   tile_dst=tile_dst, tile_src=tile_src)
    out = sage_layer(adj, deg_inv, h, pp["w_l2"], pp["w_r2"], pp["b2"],
                     apply_relu=False, out_dtype=jnp.float32,
                     tile_dst=tile_dst, tile_src=tile_src)
    return out[:n, :c_out]


# ------------------------------ references -----------------------------------
def sage_gen_reference(params, x, edge_index):
    """Pure-JAX reference mirroring the kernel's numeric recipe (bf16 operands,
    f32 accumulation, f32 post-aggregation mean normalization, bf16 layer-1 out)."""
    adj, deg_inv, x_p, pp, meta = _prepare(params, x, edge_index)
    n, c_out, _, _ = meta
    adj_b = adj.astype(jnp.bfloat16)

    def layer(xb, wl, wr, b, relu):
        proj_first = wl.shape[1] < wl.shape[0]
        if proj_first:
            xs = jnp.dot(xb, wl, preferred_element_type=jnp.float32).astype(jnp.bfloat16)
            agg = jnp.dot(adj_b, xs, preferred_element_type=jnp.float32) * deg_inv
        else:
            agg = jnp.dot(adj_b, xb, preferred_element_type=jnp.float32) * deg_inv
            agg = jnp.dot(agg.astype(jnp.bfloat16), wl, preferred_element_type=jnp.float32)
        out = agg + jnp.dot(xb, wr, preferred_element_type=jnp.float32) + b
        return jnp.maximum(out, 0.0) if relu else out

    h = layer(x_p, pp["w_l1"], pp["w_r1"], pp["b1"], True).astype(jnp.bfloat16)
    out = layer(h, pp["w_l2"], pp["w_r2"], pp["b2"], False)
    return out[:n, :c_out]


def sage_gen_reference_f32(params, x, edge_index):
    """True full-f32 reference of the PyTorch module semantics (loose check)."""
    n = x.shape[0]
    src, dst = edge_index[0], edge_index[1]
    counts = jnp.zeros((n, n), jnp.float32).at[dst, src].add(1.0)
    deg = counts.sum(axis=1, keepdims=True)
    deg_inv = jnp.where(deg > 0.0, 1.0 / jnp.maximum(deg, 1.0), 0.0)

    def layer(h, wl, wr, b, relu):
        agg = (counts @ h) * deg_inv
        out = agg @ wl + h @ wr + b
        return jnp.maximum(out, 0.0) if relu else out

    h = layer(x, params["w_l1"], params["w_r1"], params["b1"], True)
    return layer(h, params["w_l2"], params["w_r2"], params["b2"], False)


# --------------------------------- main ---------------------------------------
if __name__ == "__main__":
    key = jax.random.PRNGKey(0)
    k_feat, k_edge, k_param = jax.random.split(key, 3)

    num_nodes = 16
    in_channels = 8
    hidden_channels = 32
    out_channels = 16
    num_edges = 40

    x = jax.random.normal(k_feat, (num_nodes, in_channels), jnp.float32)
    edge_index = jax.random.randint(k_edge, (2, num_edges), 0, num_nodes, jnp.int32)

    params = init_sage_params(k_param, in_channels, hidden_channels, out_channels)

    out = sage_gen_forward(params, x, edge_index)
    out = jax.block_until_ready(out)

    ref = sage_gen_reference(params, x, edge_index)
    ref32 = sage_gen_reference_f32(params, x, edge_index)

    assert out.shape == (num_nodes, out_channels)
    assert jnp.allclose(out, ref, atol=2e-3, rtol=2e-3), "mismatch vs. mirrored reference"
    # Loose check against true f32 math (bf16 MXU operands => ~0.4% rel error/layer).
    assert jnp.allclose(out, ref32, atol=1e-1, rtol=1e-1), "mismatch vs. f32 reference"

    print("KERNEL_OK")
</pallas_src>

<mosaic_0001>
module attributes {stable_mosaic.version = 11 : i64} {
  func.func @_sage_kernel(%arg0: i32, %arg1: i32, %arg2: memref<128x128xi8, #tpu.memory_space<vmem>>, %arg3: memref<128x1xf32, #tpu.memory_space<vmem>>, %arg4: memref<128x128xbf16, #tpu.memory_space<vmem>>, %arg5: memref<128x128xbf16, #tpu.memory_space<vmem>>, %arg6: memref<128x128xbf16, #tpu.memory_space<vmem>>, %arg7: memref<128x128xbf16, #tpu.memory_space<vmem>>, %arg8: memref<1x128xf32, #tpu.memory_space<vmem>>, %arg9: memref<128x128xbf16, #tpu.memory_space<vmem>>, %arg10: memref<128x128xf32, #tpu.memory_space<vmem>>) attributes {dimension_semantics = [#tpu.dimension_semantics<parallel>, #tpu.dimension_semantics<arbitrary>], iteration_bounds = array<i64: 1, 1>, scalar_prefetch = 0 : i64, scratch_operands = 1 : i64, tpu.core_type = #tpu.core_type<tc>, window_params = [{transform_indices = @transform_0, window_bounds = array<i64: 128, 128>}, {transform_indices = @transform_1, window_bounds = array<i64: 128, 1>}, {pipeline_mode = #tpu.pipeline_mode<synchronous>, transform_indices = @transform_2, window_bounds = array<i64: 128, 128>}, {transform_indices = @transform_3, window_bounds = array<i64: 128, 128>}, {pipeline_mode = #tpu.pipeline_mode<synchronous>, transform_indices = @transform_4, window_bounds = array<i64: 128, 128>}, {pipeline_mode = #tpu.pipeline_mode<synchronous>, transform_indices = @transform_5, window_bounds = array<i64: 128, 128>}, {pipeline_mode = #tpu.pipeline_mode<synchronous>, transform_indices = @transform_6, window_bounds = array<i64: 1, 128>}, {transform_indices = @transform_7, window_bounds = array<i64: 128, 128>}]} {
    %c0_i32 = arith.constant 0 : i32
    %0 = arith.cmpi eq, %arg1, %c0_i32 : i32
    %1 = arith.extui %0 : i1 to i32
    %c0_i32_0 = arith.constant 0 : i32
    %2 = arith.cmpi ne, %1, %c0_i32_0 : i32
    scf.if %2 {
      %cst_9 = arith.constant 0.000000e+00 : f32
      %16 = vector.broadcast %cst_9 : f32 to vector<128x128xf32>
      %c0_10 = arith.constant 0 : index
      %c0_11 = arith.constant 0 : index
      %17 = vector.load %arg10[%c0_10, %c0_11] : memref<128x128xf32, #tpu.memory_space<vmem>>, vector<128x128xf32>
      tpu.vector_store %arg10[%c0_10, %c0_11], %16 {strides = array<i32>} : memref<128x128xf32, #tpu.memory_space<vmem>>, vector<128x128xf32>,
    } else {
    }
    %c0 = arith.constant 0 : index
    %c0_1 = arith.constant 0 : index
    %3 = vector.load %arg2[%c0, %c0_1] : memref<128x128xi8, #tpu.memory_space<vmem>>, vector<128x128xi8>
    %4 = arith.sitofp %3 : vector<128x128xi8> to vector<128x128xbf16>
    %c128_i32 = arith.constant 128 : i32
    %5 = arith.muli %arg1, %c128_i32 : i32
    %6 = tpu.assume_multiple %5, 128 : i32
    %7 = arith.index_cast %6 : i32 to index
    %c0_2 = arith.constant 0 : index
    %8 = vector.load %arg4[%7, %c0_2] : memref<128x128xbf16, #tpu.memory_space<vmem>>, vector<128x128xbf16>
    %c0_3 = arith.constant 0 : index
    %c0_4 = arith.constant 0 : index
    %9 = vector.load %arg10[%c0_3, %c0_4] : memref<128x128xf32, #tpu.memory_space<vmem>>, vector<128x128xf32>
    %cst = arith.constant dense<0.000000e+00> : vector<128x128xf32>
    %10 = tpu.matmul %4, %8, %cst {dimension_numbers = #tpu.dot_dimension_numbers<[1], [0], [0], [1], [0, 0, 1, 1], [], []>} : vector<128x128xbf16>, vector<128x128xbf16>, vector<128x128xf32> -> vector<128x128xf32>
    %11 = arith.addf %9, %10 : vector<128x128xf32>
    %c0_5 = arith.constant 0 : index
    %c0_6 = arith.constant 0 : index
    %12 = vector.load %arg10[%c0_5, %c0_6] : memref<128x128xf32, #tpu.memory_space<vmem>>, vector<128x128xf32>
    tpu.vector_store %arg10[%c0_5, %c0_6], %11 {strides = array<i32>} : memref<128x128xf32, #tpu.memory_space<vmem>>, vector<128x128xf32>,
    %c0_i32_7 = arith.constant 0 : i32
    %13 = arith.cmpi eq, %arg1, %c0_i32_7 : i32
    %14 = arith.extui %13 : i1 to i32
    %c0_i32_8 = arith.constant 0 : i32
    %15 = arith.cmpi ne, %14, %c0_i32_8 : i32
    scf.if %15 {
      %c0_9 = arith.constant 0 : index
      %c0_10 = arith.constant 0 : index
      %16 = vector.load %arg10[%c0_9, %c0_10] : memref<128x128xf32, #tpu.memory_space<vmem>>, vector<128x128xf32>
      %c0_11 = arith.constant 0 : index
      %c0_12 = arith.constant 0 : index
      %17 = vector.load %arg3[%c0_11, %c0_12] : memref<128x1xf32, #tpu.memory_space<vmem>>, vector<128x1xf32>
      %18 = vector.broadcast %17 : vector<128x1xf32> to vector<128x128xf32>
      %19 = arith.mulf %16, %18 : vector<128x128xf32>
      %20 = arith.truncf %19 : vector<128x128xf32> to vector<128x128xbf16>
      %c0_13 = arith.constant 0 : index
      %c0_14 = arith.constant 0 : index
      %21 = vector.load %arg6[%c0_13, %c0_14] : memref<128x128xbf16, #tpu.memory_space<vmem>>, vector<128x128xbf16>
      %cst_15 = arith.constant dense<0.000000e+00> : vector<128x128xf32>
      %22 = tpu.matmul %20, %21, %cst_15 {dimension_numbers = #tpu.dot_dimension_numbers<[1], [0], [0], [1], [0, 0, 1, 1], [], []>} : vector<128x128xbf16>, vector<128x128xbf16>, vector<128x128xf32> -> vector<128x128xf32>
      %c0_16 = arith.constant 0 : index
      %c0_17 = arith.constant 0 : index
      %23 = vector.load %arg5[%c0_16, %c0_17] : memref<128x128xbf16, #tpu.memory_space<vmem>>, vector<128x128xbf16>
      %c0_18 = arith.constant 0 : index
      %c0_19 = arith.constant 0 : index
      %24 = vector.load %arg7[%c0_18, %c0_19] : memref<128x128xbf16, #tpu.memory_space<vmem>>, vector<128x128xbf16>
      %cst_20 = arith.constant dense<0.000000e+00> : vector<128x128xf32>
      %25 = tpu.matmul %23, %24, %cst_20 {dimension_numbers = #tpu.dot_dimension_numbers<[1], [0], [0], [1], [0, 0, 1, 1], [], []>} : vector<128x128xbf16>, vector<128x128xbf16>, vector<128x128xf32> -> vector<128x128xf32>
      %26 = arith.addf %22, %25 : vector<128x128xf32>
      %c0_21 = arith.constant 0 : index
      %c0_22 = arith.constant 0 : index
      %27 = vector.load %arg8[%c0_21, %c0_22] : memref<1x128xf32, #tpu.memory_space<vmem>>, vector<1x128xf32>
      %28 = vector.broadcast %27 : vector<1x128xf32> to vector<128x128xf32>
      %29 = arith.addf %26, %28 : vector<128x128xf32>
      %cst_23 = arith.constant 0.000000e+00 : f32
      %30 = vector.broadcast %cst_23 : f32 to vector<128x128xf32>
      %31 = arith.maximumf %29, %30 : vector<128x128xf32>
      %32 = arith.truncf %31 : vector<128x128xf32> to vector<128x128xbf16>
      %c0_24 = arith.constant 0 : index
      %c0_25 = arith.constant 0 : index
      %33 = vector.load %arg9[%c0_24, %c0_25] : memref<128x128xbf16, #tpu.memory_space<vmem>>, vector<128x128xbf16>
      tpu.vector_store %arg9[%c0_24, %c0_25], %32 {strides = array<i32>} : memref<128x128xbf16, #tpu.memory_space<vmem>>, vector<128x128xbf16>,
    } else {
    }
    return
  }
  func.func @transform_0(%arg0: i32, %arg1: i32) -> (i32, i32) {
    %c0_i32 = arith.constant 0 : i32
    return %arg0, %arg1 : i32, i32
  }
  func.func @transform_1(%arg0: i32, %arg1: i32) -> (i32, i32) {
    %c0_i32 = arith.constant 0 : i32
    %c0_i32_0 = arith.constant 0 : i32
    return %arg0, %c0_i32 : i32, i32
  }
  func.func @transform_2(%arg0: i32, %arg1: i32) -> (i32, i32) {
    %c0_i32 = arith.constant 0 : i32
    %c0_i32_0 = arith.constant 0 : i32
    %c0_i32_1 = arith.constant 0 : i32
    return %c0_i32, %c0_i32_0 : i32, i32
  }
  func.func @transform_3(%arg0: i32, %arg1: i32) -> (i32, i32) {
    %c0_i32 = arith.constant 0 : i32
    %c0_i32_0 = arith.constant 0 : i32
    return %arg0, %c0_i32 : i32, i32
  }
  func.func @transform_4(%arg0: i32, %arg1: i32) -> (i32, i32) {
    %c0_i32 = arith.constant 0 : i32
    %c0_i32_0 = arith.constant 0 : i32
    %c0_i32_1 = arith.constant 0 : i32
    return %c0_i32, %c0_i32_0 : i32, i32
  }
  func.func @transform_5(%arg0: i32, %arg1: i32) -> (i32, i32) {
    %c0_i32 = arith.constant 0 : i32
    %c0_i32_0 = arith.constant 0 : i32
    %c0_i32_1 = arith.constant 0 : i32
    return %c0_i32, %c0_i32_0 : i32, i32
  }
  func.func @transform_6(%arg0: i32, %arg1: i32) -> (i32, i32) {
    %c0_i32 = arith.constant 0 : i32
    %c0_i32_0 = arith.constant 0 : i32
    %c0_i32_1 = arith.constant 0 : i32
    return %c0_i32, %c0_i32_0 : i32, i32
  }
  func.func @transform_7(%arg0: i32, %arg1: i32) -> (i32, i32) {
    %c0_i32 = arith.constant 0 : i32
    %c0_i32_0 = arith.constant 0 : i32
    return %arg0, %c0_i32 : i32, i32
  }
}

</mosaic_0001>

<bundles_post_ra>
// kernel: tpu_custom_call.1
= control target key start
LH: loop header
LB: loop body
LE: loop exit
PB: predicated region body
PF: predicated region fallthrough
CT: control target
= control target key end

     0   :  { %12 = vsyncpa [#allocation4], 0  ;;  %s1631_s0 = inlined_call_operand.hbm [shape: s8[128,128], index: 0, kind: input, shape index: {}]   ;;  %s1632_s1 = inlined_call_operand.vmem [shape: f32[128,1], index: 1, kind: input, shape index: {}]   ;;  %s1633_s2 = inlined_call_operand.vmem [shape: bf16[128,128], index: 2, kind: input, shape index: {}]   ;;  %s1634_s3 = inlined_call_operand.vmem [shape: bf16[128,128], index: 3, kind: input, shape index: {}]   ;;  %s1635_s4 = inlined_call_operand.hbm [shape: bf16[128,128], index: 4, kind: input, shape index: {}]   ;;  %s1636_s5 = inlined_call_operand.hbm [shape: bf16[128,128], index: 5, kind: input, shape index: {}]   ;;  %s1637_s6 = inlined_call_operand.vmem [shape: f32[1,128], index: 6, kind: input, shape index: {}]   ;;  %s1638_s7 = inlined_call_operand.hbm [shape: bf16[128,128], index: 7, kind: output, shape index: {}]  }
   0x1   :  { %13 = vsyncpa [#allocation7], 0 }
   0x2   :  { %14 = vsyncpa [#allocation5], 0  ;;  %s1404_s24 = smov [#allocation6]   ;;  %s1310_s28 = scalar_lea.hbm %s1635_s4, 1024 }
   0x3   :  { %s38_s25 = sshll.u32 %s1404_s24, 4  ;;  %p1311_p0 = scmp.ne.s32.totalorder %s1635_s4, %s1310_s28  ;;  %s39_s25 = int_to_ptr.vmem [resolvable:$true] %s38_s25 }
   0x4   :  { %p1314_p1 = scmp.lt.u32.totalorder %s1310_s28, %s1635_s4 }
   0x6   :  { %p1316_p2 = pnand %p1314_p1, %p1311_p0 }
   0x8   :  { %1319 = shalt.err (!%p1316_p2)
}
   0x9   :  { %s1320_s10 = scalar_lea.vmem %s39_s25, 1024  ;;  %p1325_p4 = scmp.lt.s32.totalorder %s39_s25, %s39_s25 }
   0xa   :  { %p1321_p3 = scmp.ne.s32.totalorder %s39_s25, %s1320_s10  ;;  %p1326_p5 = scmp.lt.s32.totalorder %s1320_s10, %s1320_s10 }
   0xc   :  { %p1327_p6 = por %p1326_p5, %p1325_p4 }
   0xe   :  { %p1328_p7 = pnand %p1327_p6, %p1321_p3 }
  0x10   :  { %1331 = shalt.err (!%p1328_p7)
}
  0x11   :  { %s1405_s11 = smov 64   ;;  %s1406_s12 = smov 4  }
  0x12   :  { %44 = dma.hbm_to_vmem [thread:$0]  %s1635_s4, 1024, %s39_s25, [#allocation7], %s1405_s11, %s1405_s11, %s1406_s12  }
  0x13   :  { %s1407_s15 = smov [#allocation3]   ;;  %s1332_s19 = scalar_lea.hbm %s1631_s0, 512 }
  0x14   :  { %s20_s16 = sshll.u32 %s1407_s15, 4  ;;  %p1333_p8 = scmp.ne.s32.totalorder %s1631_s0, %s1332_s19  ;;  %s21_s16 = int_to_ptr.vmem [resolvable:$true] %s20_s16 }
  0x15   :  { %p1336_p9 = scmp.lt.u32.totalorder %s1332_s19, %s1631_s0 }
  0x17   :  { %p1338_p10 = pnand %p1336_p9, %p1333_p8 }
  0x19   :  { %1341 = shalt.err (!%p1338_p10)
}
  0x1a   :  { %s1342_s24 = scalar_lea.vmem %s21_s16, 512  ;;  %p1347_p12 = scmp.lt.s32.totalorder %s21_s16, %s21_s16 }
  0x1b   :  { %p1343_p11 = scmp.ne.s32.totalorder %s21_s16, %s1342_s24  ;;  %p1348_p13 = scmp.lt.s32.totalorder %s1342_s24, %s1342_s24 }
  0x1d   :  { %p1349_p0 = por %p1348_p13, %p1347_p12 }
  0x1f   :  { %p1350_p1 = pnand %p1349_p0, %p1343_p11 }
  0x21   :  { %1353 = shalt.err (!%p1350_p1)
}
  0x22   :  { %s1408_s4 = smov 128   ;;  %s1409_s25 = smov 8  }
  0x23   :  { %26 = dma.hbm_to_vmem [thread:$0]  %s1631_s0, 512, %s21_s16, [#allocation4], %s1408_s4, %s1408_s4, %s1409_s25  }
  0x24   :  { %s1410_s28 = smov [#allocation8]   ;;  %s1354_s9 = scalar_lea.hbm %s1636_s5, 1024 }
  0x25   :  { %s50_s29 = sshll.u32 %s1410_s28, 4  ;;  %p1355_p2 = scmp.ne.s32.totalorder %s1636_s5, %s1354_s9  ;;  %s51_s29 = int_to_ptr.vmem [resolvable:$true] %s50_s29 }
  0x26   :  { %p1358_p3 = scmp.lt.u32.totalorder %s1354_s9, %s1636_s5 }
  0x28   :  { %p1360_p4 = pnand %p1358_p3, %p1355_p2 }
  0x2a   :  { %1363 = shalt.err (!%p1360_p4)
}
  0x2b   :  { %s1364_s17 = scalar_lea.vmem %s51_s29, 1024  ;;  %p1369_p6 = scmp.lt.s32.totalorder %s51_s29, %s51_s29 }
  0x2c   :  { %p1365_p5 = scmp.ne.s32.totalorder %s51_s29, %s1364_s17  ;;  %p1370_p7 = scmp.lt.s32.totalorder %s1364_s17, %s1364_s17 }
  0x2e   :  { %p1371_p8 = por %p1370_p7, %p1369_p6 }
  0x30   :  { %p1372_p9 = pnand %p1371_p8, %p1365_p5 }
  0x32   :  { %1375 = shalt.err (!%p1372_p9)
}
  0x33   :  { %56 = dma.hbm_to_vmem [thread:$0]  %s1636_s5, 1024, %s51_s29, [#allocation7], %s1405_s11, %s1405_s11, %s1406_s12  }
  0x34   :  { %1398 = dma.done.wait [#allocation4], 512  }
  0x35   :  { %1399 = vsyncadd [#allocation4], 4294966784 }
  0x36   :  { %1400 = dma.done.wait [#allocation7], 2048  }
  0x37   :  { %1401 = vsyncadd [#allocation7], 4294965248  ;;  %v1411_v0 = vmov 0   ;;  %v1278_v1 = vld [vmem:[%s1633_s2] sm:$0xff]   ;;  %v1279_v2 = vld [vmem:[%s1633_s2 + $0x8] sm:$0xff]  }
  0x38   :  { %1277 = vset.pattern.permute.xlu1 %v1411_v0  ;;  %1276 = vset.pattern.permute.xlu0 %v1411_v0  ;;  %v1280_v3 = vld [vmem:[%s1633_s2 + $0x10] sm:$0xff]   ;;  %v1281_v4 = vld [vmem:[%s1633_s2 + $0x18] sm:$0xff]   ;;  %v1507_v5 = vld [vmem:[#allocation3] sm:$0xff] }
  0x39   :  { %1139 = vmatprep.subr.bf16.mxu0 %v1278_v1  ;;  %v93_v6 = vunpack.c.l.s8.bf16 %v1507_v5  ;;  %v336_v7 = vld [vmem:[%s1632_s1 + $0x10] sm:$0xff]  ;;  %v334_v8 = vld [vmem:[%s1632_s1] sm:$0xff]  ;;  %v337_v9 = vld [vmem:[%s1632_s1 + $0x18] sm:$0xff]  ;;  %v94_v32 = vunpack.c.h.s8.bf16 %v1507_v5 }
  0x3a   :  { %1140 = vmatpush3.bf16.msra.mxu0 %v1278_v1  ;;  %362 = vperm.xlu1 %1277, %v336_v7   ;;  %v335_v10 = vld [vmem:[%s1632_s1 + $0x8] sm:$0xff]  ;;  %v1282_v11 = vld [vmem:[%s1633_s2 + $0x20] sm:$0xff]   ;;  %v1284_v17 = vld [vmem:[%s1633_s2 + $0x30] sm:$0xff]  }
  0x3b   :  { %1141 = vmatprep.subr.bf16.mxu0 %v1279_v2  ;;  %352 = vperm.xlu0 %1276, %v334_v8   ;;  %v1283_v12 = vld [vmem:[%s1633_s2 + $0x28] sm:$0xff]   ;;  %v342_v14 = vld [vmem:[%s1632_s1 + $0x40] sm:$0xff]  ;;  %v345_v18 = vld [vmem:[%s1632_s1 + $0x58] sm:$0xff] }
  0x3c   :  { %1155 = vmatprep.mubr.bf16.mxu0 %v93_v6  ;;  %v343_v13 = vld [vmem:[%s1632_s1 + $0x48] sm:$0xff]  ;;  %v1286_v15 = vld [vmem:[#allocation8] sm:$0xff]   ;;  %v344_v19 = vld [vmem:[%s1632_s1 + $0x50] sm:$0xff] }
  0x3d   :  { %v1287_v16 = vld [vmem:[#allocation8 + $0x8] sm:$0xff]   ;;  %1171 = vmatprep.subr.bf16.mxu1 %v1286_v15  ;;  %v1288_v20 = vld [vmem:[#allocation8 + $0x10] sm:$0xff]   ;;  %v1285_v21 = vld [vmem:[%s1633_s2 + $0x38] sm:$0xff]  }
  0x3e   :  { %1142 = vmatpush3.bf16.msra.mxu0 %v1279_v2  ;;  %367 = vperm.xlu1 %1277, %v337_v9   ;;  %v339_v22 = vld [vmem:[%s1632_s1 + $0x28] sm:$0xff]  ;;  %v338_v23 = vld [vmem:[%s1632_s1 + $0x20] sm:$0xff]  ;;  %v1289_v24 = vld [vmem:[#allocation8 + $0x18] sm:$0xff]  }
  0x3f   :  { %1143 = vmatprep.subr.bf16.mxu0 %v1280_v3  ;;  %357 = vperm.xlu0 %1276, %v335_v10   ;;  %v341_v25 = vld [vmem:[%s1632_s1 + $0x38] sm:$0xff]  ;;  %v340_v26 = vld [vmem:[%s1632_s1 + $0x30] sm:$0xff]  ;;  %v90_v27 = vld [vmem:[#allocation3 + $0x8] sm:$0xff] }
  0x40   :  { %1172 = vmatpush3.bf16.msra.mxu1 %v1286_v15  ;;  %v1297_v28 = vld [vmem:[%s1634_s3] sm:$0xff]   ;;  %v347_v31 = vld [vmem:[%s1632_s1 + $0x68] sm:$0xff]  ;;  %v95_v34 = vunpack.c.l.s8.bf16 %v90_v27  ;;  %v91_v37 = vld [vmem:[#allocation3 + $0x10] sm:$0xff]  ;;  %v96_v42 = vunpack.c.h.s8.bf16 %v90_v27 }
  0x41   :  { %1173 = vmatprep.subr.bf16.mxu1 %v1287_v16  ;;  %v1290_v29 = vld [vmem:[#allocation8 + $0x20] sm:$0xff]   ;;  %1187 = vmatprep.mubr.bf16.mxu1 %v1297_v28  ;;  %v1292_v35 = vld [vmem:[#allocation8 + $0x28] sm:$0xff]   ;;  %v349_v38 = vld [vmem:[%s1632_s1 + $0x78] sm:$0xff]  ;;  %v97_v43 = vunpack.c.l.s8.bf16 %v91_v37  ;;  %v98_v48 = vunpack.c.h.s8.bf16 %v91_v37 }
  0x42   :  { %1144 = vmatpush3.bf16.msra.mxu0 %v1280_v3  ;;  %397 = vperm.xlu1 %1277, %v343_v13   ;;  %v1291_v30 = vld [vmem:[#allocation6] sm:$0xff]   ;;  %v1293_v36 = vld [vmem:[#allocation6 + $0x8] sm:$0xff]   ;;  %v348_v39 = vld [vmem:[%s1632_s1 + $0x70] sm:$0xff] }
  0x43   :  { %1145 = vmatprep.subr.bf16.mxu0 %v1281_v4  ;;  %392 = vperm.xlu0 %1276, %v342_v14   ;;  %v346_v33 = vld [vmem:[%s1632_s1 + $0x60] sm:$0xff]  ;;  %v1294_v40 = vld [vmem:[#allocation8 + $0x30] sm:$0xff]   ;;  %v1296_v44 = vld [vmem:[#allocation8 + $0x38] sm:$0xff]  }
  0x44   :  { %1174 = vmatpush3.bf16.msra.mxu1 %v1287_v16  ;;  %v1295_v41 = vld [vmem:[#allocation6 + $0x10] sm:$0xff]   ;;  %v1298_v45 = vld [vmem:[#allocation6 + $0x18] sm:$0xff]   ;;  %v1300_v47 = vld [vmem:[#allocation6 + $0x20] sm:$0xff]  }
  0x45   :  { %1175 = vmatprep.subr.bf16.mxu1 %v1288_v20  ;;  %v92_v46 = vld [vmem:[#allocation3 + $0x18] sm:$0xff]  ;;  %v1299_v50 = vld [vmem:[%s1634_s3 + $0x8] sm:$0xff]   ;;  %v1301_v51 = vld [vmem:[%s1634_s3 + $0x10] sm:$0xff]  }
  0x46   :  { %1146 = vmatpush3.bf16.msra.mxu0 %v1281_v4  ;;  %407 = vperm.xlu1 %1277, %v345_v18   ;;  %v99_v49 = vunpack.c.l.s8.bf16 %v92_v46  ;;  %v1302_v52 = vld [vmem:[#allocation6 + $0x28] sm:$0xff]   ;;  %v100_v53 = vunpack.c.h.s8.bf16 %v92_v46  ;;  %v1303_v54 = vld [vmem:[%s1634_s3 + $0x18] sm:$0xff]   ;;  %v1304_v55 = vld [vmem:[#allocation6 + $0x30] sm:$0xff]  }
  0x47   :  { %1147 = vmatprep.subr.bf16.mxu0 %v1282_v11  ;;  %402 = vperm.xlu0 %1276, %v344_v19   ;;  %v1305_v56 = vld [vmem:[#allocation6 + $0x38] sm:$0xff]   ;;  %v1306_v57 = vld [vmem:[%s1634_s3 + $0x20] sm:$0xff]   ;;  %v1307_v58 = vld [vmem:[%s1634_s3 + $0x28] sm:$0xff]  }
  0x48   :  { %1176 = vmatpush3.bf16.msra.mxu1 %v1288_v20  ;;  %v1308_v59 = vld [vmem:[%s1634_s3 + $0x30] sm:$0xff]   ;;  %v1309_v60 = vld [vmem:[%s1634_s3 + $0x38] sm:$0xff]  }
  0x49   :  { %1177 = vmatprep.subr.bf16.mxu1 %v1289_v24 }
  0x4a   :  { %1148 = vmatpush3.bf16.msra.mxu0 %v1282_v11  ;;  %377 = vperm.xlu1 %1277, %v339_v22  }
  0x4b   :  { %1149 = vmatprep.subr.bf16.mxu0 %v1283_v12  ;;  %372 = vperm.xlu0 %1276, %v338_v23  }
  0x4c   :  { %1178 = vmatpush3.bf16.msra.mxu1 %v1289_v24 }
  0x4d   :  { %1179 = vmatprep.subr.bf16.mxu1 %v1290_v29 }
  0x4e   :  { %1150 = vmatpush3.bf16.msra.mxu0 %v1283_v12  ;;  %387 = vperm.xlu1 %1277, %v341_v25  }
  0x4f   :  { %1151 = vmatprep.subr.bf16.mxu0 %v1284_v17  ;;  %382 = vperm.xlu0 %1276, %v340_v26  }
  0x50   :  { %1180 = vmatpush3.bf16.msra.mxu1 %v1290_v29 }
  0x51   :  { %1181 = vmatprep.subr.bf16.mxu1 %v1292_v35 }
  0x52   :  { %1152 = vmatpush3.bf16.msra.mxu0 %v1284_v17  ;;  %417 = vperm.xlu1 %1277, %v347_v31  }
  0x53   :  { %1153 = vmatprep.subr.bf16.mxu0 %v1285_v21  ;;  %412 = vperm.xlu0 %1276, %v346_v33  }
  0x54   :  { %1182 = vmatpush3.bf16.msra.mxu1 %v1292_v35 }
  0x55   :  { %1183 = vmatprep.subr.bf16.mxu1 %v1294_v40 }
  0x56   :  { %1154 = vmatpush3.bf16.msra.mxu0 %v1285_v21  ;;  %427 = vperm.xlu1 %1277, %v349_v38  }
  0x57   :  { %1203 = vmatprep.subr.bf16.mxu0 %v1291_v30  ;;  %422 = vperm.xlu0 %1276, %v348_v39  }
  0x58   :  { %1184 = vmatpush3.bf16.msra.mxu1 %v1294_v40 }
  0x59   :  { %1156 = vmatmul.mubr.bf16.vlgmr.msra.gmra.mrb[0].mxu0 %v94_v32  ;;  %1185 = vmatprep.subr.bf16.mxu1 %v1296_v44 }
  0x5a   :  { %1159 = vmatprep.mubr.bf16.mxu0 %v95_v34  ;;  %1204 = vmatpush3.bf16.msra.mxu0 %v1291_v30 }
  0x5b   :  { %1205 = vmatprep.subr.bf16.mxu0 %v1293_v36 }
  0x5c   :  { %1186 = vmatpush3.bf16.msra.mxu1 %v1296_v44 }
  0x5d   :  { %1235 = vmatprep.subr.bf16.mxu1 %v1291_v30 }
  0x5e   :  { %1206 = vmatpush3.bf16.msra.mxu0 %v1293_v36 }
  0x5f   :  { %1207 = vmatprep.subr.bf16.mxu0 %v1295_v41  ;;  %1188 = vmatmul.mubr.bf16.vlgmr.msra.gmra.mrb[0].mxu1 %v1299_v50 }
  0x60   :  { %1243 = vmatpush3.bf16.msra.mxu1 %v1291_v30  ;;  %1191 = vmatprep.mubr.bf16.mxu1 %v1301_v51 }
  0x61   :  { %1160 = vmatmul.mubr.bf16.gmra.mrb[4].mxu0 %v96_v42  ;;  %1236 = vmatprep.subr.bf16.mxu1 %v1293_v36 }
  0x62   :  { %1163 = vmatprep.mubr.bf16.mxu0 %v97_v43  ;;  %1208 = vmatpush3.bf16.msra.mxu0 %v1295_v41 }
  0x63   :  { %1209 = vmatprep.subr.bf16.mxu0 %v1298_v45 }
  0x64   :  { %1244 = vmatpush3.bf16.msra.mxu1 %v1293_v36 }
  0x65   :  { %1237 = vmatprep.subr.bf16.mxu1 %v1295_v41 }
  0x66   :  { %1210 = vmatpush3.bf16.msra.mxu0 %v1298_v45 }
  0x67   :  { %1211 = vmatprep.subr.bf16.mxu0 %v1300_v47  ;;  %1192 = vmatmul.mubr.bf16.gmra.mrb[4].mxu1 %v1303_v54 }
  0x68   :  { %1245 = vmatpush3.bf16.msra.mxu1 %v1295_v41  ;;  %1195 = vmatprep.mubr.bf16.mxu1 %v1306_v57 }
  0x69   :  { %1164 = vmatmul.mubr.bf16.gmra.mrb[8].mxu0 %v98_v48  ;;  %1238 = vmatprep.subr.bf16.mxu1 %v1298_v45 }
  0x6a   :  { %1167 = vmatprep.mubr.bf16.mxu0 %v99_v49  ;;  %1212 = vmatpush3.bf16.msra.mxu0 %v1300_v47 }
  0x6b   :  { %1213 = vmatprep.subr.bf16.mxu0 %v1302_v52 }
  0x6c   :  { %1246 = vmatpush3.bf16.msra.mxu1 %v1298_v45 }
  0x6d   :  { %1239 = vmatprep.subr.bf16.mxu1 %v1300_v47 }
  0x6e   :  { %1214 = vmatpush3.bf16.msra.mxu0 %v1302_v52 }
  0x6f   :  { %1215 = vmatprep.subr.bf16.mxu0 %v1304_v55  ;;  %1196 = vmatmul.mubr.bf16.gmra.mrb[8].mxu1 %v1307_v58 }
  0x70   :  { %1247 = vmatpush3.bf16.msra.mxu1 %v1300_v47  ;;  %1199 = vmatprep.mubr.bf16.mxu1 %v1308_v59 }
  0x71   :  { %1168 = vmatmul.mubr.bf16.gmra.mrb[12].mxu0 %v100_v53  ;;  %1240 = vmatprep.subr.bf16.mxu1 %v1302_v52 }
  0x72   :  { %1216 = vmatpush3.bf16.msra.mxu0 %v1304_v55 }
  0x73   :  { %1217 = vmatprep.subr.bf16.mxu0 %v1305_v56 }
  0x74   :  { %1248 = vmatpush3.bf16.msra.mxu1 %v1302_v52 }
  0x75   :  { %1241 = vmatprep.subr.bf16.mxu1 %v1304_v55 }
  0x76   :  { %1218 = vmatpush3.bf16.msra.mxu0 %v1305_v56 }
  0x77   :  { %1200 = vmatmul.mubr.bf16.gmra.mrb[12].mxu1 %v1309_v60 }
  0x78   :  { %1249 = vmatpush3.bf16.msra.mxu1 %v1304_v55 }
  0x79   :  { %1242 = vmatprep.subr.bf16.mxu1 %v1305_v56 }
  0x7c   :  { %1250 = vmatpush3.bf16.msra.mxu1 %v1305_v56 }
  0xb9   :  { %v363_v61 = vpop.permute.xlu1 %362 }
  0xba   :  { %v353_v62 = vpop.permute.xlu0 %352 }
  0xbd   :  { %v368_v63 = vpop.permute.xlu1 %367 }
  0xbe   :  { %v358_v0 = vpop.permute.xlu0 %357 }
  0xc1   :  { %v398_v1 = vpop.permute.xlu1 %397 }
  0xc2   :  { %v393_v2 = vpop.permute.xlu0 %392 }
  0xc5   :  { %v408_v3 = vpop.permute.xlu1 %407 }
  0xc6   :  { %v403_v4 = vpop.permute.xlu0 %402 }
  0xc9   :  { %v378_v8 = vpop.permute.xlu1 %377 }
  0xca   :  { %v373_v12 = vpop.permute.xlu0 %372 }
  0xcd   :  { %v388_v18 = vpop.permute.xlu1 %387 }
  0xce   :  { %v383_v20 = vpop.permute.xlu0 %382 }
  0xd1   :  { %v418_v29 = vpop.permute.xlu1 %417 }
  0xd2   :  { %v413_v30 = vpop.permute.xlu0 %412 }
  0xd5   :  { %v428_v45 = vpop.permute.xlu1 %427 }
  0xd6   :  { %v423_v46 = vpop.permute.xlu0 %422 }
 0x12c   :  { %v1157_v5 = vpop.f32.mrb[0].mxu0 }
 0x12d   :  { %v220_v6 = vpop.f32.mrb[1].mxu0  ;;  %v432_v9 = vmul.f32 %v1157_v5, %v363_v61 }
 0x12e   :  { %v1158_v7 = vpop.f32.mrb[2].mxu0  ;;  %v430_v13 = vmul.f32 %v353_v62, %v220_v6  ;;  %v1598_v62 = vld [vmem:[%s1637_s6] ss:$0 sm:$0xff]  ;;  %s1412_s6 = smov [#allocation9]  }
 0x12f   :  { %v433_v10 = vmul.f32 %v1158_v7, %v368_v63  ;;  %v223_v11 = vpop.f32.mrb[3].mxu0  ;;  %s964_s30 = sshll.u32 %s1412_s6, 4  ;;  %s965_s30 = int_to_ptr.vmem [resolvable:$true] %s964_s30 }
 0x130   :  { %v431_v14 = vmul.f32 %v358_v0, %v223_v11  ;;  %s1376_s8 = scalar_lea.vmem %s965_s30, 1024  ;;  %p1381_p11 = scmp.lt.s32.totalorder %s965_s30, %s965_s30 }
 0x131   :  { %v447_v15 = vpack.c.bf16 %v433_v10, %v432_v9  ;;  %p1377_p10 = scmp.ne.s32.totalorder %s965_s30, %s1376_s8  ;;  %p1382_p12 = scmp.lt.s32.totalorder %s1376_s8, %s1376_s8 }
 0x132   :  { %v446_v16 = vpack.c.bf16 %v431_v14, %v430_v13  ;;  %v1189_v33 = vpop.f32.mrb[0].mxu1 }
 0x133   :  { %v632_v35 = vpop.f32.mrb[1].mxu1  ;;  %p1383_p13 = por %p1382_p12, %p1381_p11 }
 0x134   :  { %v1161_v17 = vpop.f32.mrb[4].mxu0  ;;  %1219 = vmatprep.mubr.bf16.mxu0 %v446_v16  ;;  %v1190_v39 = vpop.f32.mrb[2].mxu1 }
 0x135   :  { %v236_v19 = vpop.f32.mrb[5].mxu0  ;;  %1220 = vmatmul.mubr.bf16.vlgmr.msra.gmra.mrb[16].mxu0 %v447_v15  ;;  %v436_v22 = vmul.f32 %v1161_v17, %v383_v20  ;;  %v635_v42 = vpop.f32.mrb[3].mxu1  ;;  %p1384_p0 = pnand %p1383_p13, %p1377_p10 }
 0x136   :  { %v1162_v21 = vpop.f32.mrb[6].mxu0  ;;  %v434_v25 = vmul.f32 %v373_v12, %v236_v19 }
 0x137   :  { %v437_v23 = vmul.f32 %v1162_v21, %v388_v18  ;;  %v239_v24 = vpop.f32.mrb[7].mxu0 }
 0x138   :  { %v435_v26 = vmul.f32 %v378_v8, %v239_v24 }
 0x139   :  { %v449_v27 = vpack.c.bf16 %v437_v23, %v436_v22 }
 0x13a   :  { %v448_v28 = vpack.c.bf16 %v435_v26, %v434_v25  ;;  %v1193_v49 = vpop.f32.mrb[4].mxu1 }
 0x13b   :  { %v648_v51 = vpop.f32.mrb[5].mxu1 }
 0x13c   :  { %v1165_v31 = vpop.f32.mrb[8].mxu0  ;;  %1223 = vmatprep.mubr.bf16.mxu0 %v448_v28  ;;  %v1194_v55 = vpop.f32.mrb[6].mxu1 }
 0x13d   :  { %v252_v32 = vpop.f32.mrb[9].mxu0  ;;  %1224 = vmatmul.mubr.bf16.gmra.mrb[20].mxu0 %v449_v27  ;;  %v440_v36 = vmul.f32 %v1165_v31, %v403_v4  ;;  %v651_v58 = vpop.f32.mrb[7].mxu1 }
 0x13e   :  { %v1166_v34 = vpop.f32.mrb[10].mxu0  ;;  %v438_v40 = vmul.f32 %v393_v2, %v252_v32 }
 0x13f   :  { %v441_v37 = vmul.f32 %v1166_v34, %v408_v3  ;;  %v255_v38 = vpop.f32.mrb[11].mxu0 }
 0x140   :  { %v439_v41 = vmul.f32 %v398_v1, %v255_v38 }
 0x141   :  { %v451_v43 = vpack.c.bf16 %v441_v37, %v440_v36 }
 0x142   :  { %v450_v44 = vpack.c.bf16 %v439_v41, %v438_v40 }
 0x144   :  { %v1169_v47 = vpop.f32.mrb[12].mxu0  ;;  %1227 = vmatprep.mubr.bf16.mxu1 %v450_v44 }
 0x145   :  { %v268_v48 = vpop.f32.mrb[13].mxu0  ;;  %1228 = vmatmul.mubr.bf16.vlgmr.msra.gmra.mrb[8].mxu1 %v451_v43  ;;  %v444_v52 = vmul.f32 %v1169_v47, %v423_v46 }
 0x146   :  { %v1170_v50 = vpop.f32.mrb[14].mxu0  ;;  %v442_v56 = vmul.f32 %v413_v30, %v268_v48 }
 0x147   :  { %v445_v53 = vmul.f32 %v1170_v50, %v428_v45  ;;  %v271_v54 = vpop.f32.mrb[15].mxu0 }
 0x148   :  { %v443_v57 = vmul.f32 %v418_v29, %v271_v54 }
 0x149   :  { %v453_v59 = vpack.c.bf16 %v445_v53, %v444_v52 }
 0x14a   :  { %v452_v60 = vpack.c.bf16 %v443_v57, %v442_v56 }
 0x14c   :  { %1231 = vmatprep.mubr.bf16.mxu1 %v452_v60 }
 0x14d   :  { %1232 = vmatmul.mubr.bf16.gmra.mrb[12].mxu1 %v453_v59 }
 0x208   :  { %v1221_v61 = vpop.f32.mrb[16].mxu0 }
 0x209   :  { %v786_v63 = vadd.f32 %v1221_v61, %v1189_v33  ;;  %v777_v0 = vpop.f32.mrb[17].mxu0 }
 0x20a   :  { %v778_v1 = vadd.f32 %v777_v0, %v632_v35  ;;  %v1222_v2 = vpop.f32.mrb[18].mxu0 }
 0x20b   :  { %v849_v3 = vadd.f32 %v1598_v62, %v786_v63  ;;  %v789_v4 = vadd.f32 %v1222_v2, %v1190_v39  ;;  %v780_v5 = vpop.f32.mrb[19].mxu0 }
 0x20c   :  { %v847_v6 = vadd.f32 %v1598_v62, %v778_v1  ;;  %v781_v7 = vadd.f32 %v780_v5, %v635_v42 }
 0x20d   :  { %v850_v8 = vadd.f32 %v1598_v62, %v789_v4  ;;  %v865_v10 = vmax.f32 %v849_v3, 0.0 }
 0x20e   :  { %v848_v9 = vadd.f32 %v1598_v62, %v781_v7  ;;  %v863_v12 = vmax.f32 %v847_v6, 0.0 }
 0x20f   :  { %v866_v11 = vmax.f32 %v850_v8, 0.0 }
 0x210   :  { %v864_v13 = vmax.f32 %v848_v9, 0.0  ;;  %v1225_v14 = vpop.f32.mrb[20].mxu0 }
 0x211   :  { %v1052_v15 = vpack.c.bf16 %v866_v11, %v865_v10  ;;  %v802_v16 = vadd.f32 %v1225_v14, %v1193_v49  ;;  %v793_v17 = vpop.f32.mrb[21].mxu0 }
 0x212   :  { %v1047_v18 = vpack.c.bf16 %v864_v13, %v863_v12  ;;  %v794_v19 = vadd.f32 %v793_v17, %v648_v51  ;;  %v1226_v20 = vpop.f32.mrb[22].mxu0 }
 0x213   :  { %1084 = vst [vmem:[#allocation9 + $0x8] sm:$0xff] %v1052_v15   ;;  %v853_v21 = vadd.f32 %v1598_v62, %v802_v16  ;;  %v805_v22 = vadd.f32 %v1226_v20, %v1194_v55  ;;  %v796_v23 = vpop.f32.mrb[23].mxu0 }
 0x214   :  { %1048 = vst [vmem:[#allocation9] sm:$0xff] %v1047_v18   ;;  %v851_v24 = vadd.f32 %v1598_v62, %v794_v19  ;;  %v797_v25 = vadd.f32 %v796_v23, %v651_v58 }
 0x215   :  { %v854_v26 = vadd.f32 %v1598_v62, %v805_v22  ;;  %v869_v28 = vmax.f32 %v853_v21, 0.0 }
 0x216   :  { %v852_v27 = vadd.f32 %v1598_v62, %v797_v25  ;;  %v867_v30 = vmax.f32 %v851_v24, 0.0 }
 0x217   :  { %v870_v29 = vmax.f32 %v854_v26, 0.0 }
 0x218   :  { %v868_v31 = vmax.f32 %v852_v27, 0.0  ;;  %v1229_v32 = vpop.f32.mrb[8].mxu1 }
 0x219   :  { %v1062_v33 = vpack.c.bf16 %v870_v29, %v869_v28  ;;  %v857_v34 = vadd.f32 %v1229_v32, %v1598_v62  ;;  %v809_v35 = vpop.f32.mrb[9].mxu1 }
 0x21a   :  { %v1057_v36 = vpack.c.bf16 %v868_v31, %v867_v30  ;;  %v855_v37 = vadd.f32 %v1598_v62, %v809_v35  ;;  %v1230_v38 = vpop.f32.mrb[10].mxu1 }
 0x21b   :  { %1086 = vst [vmem:[#allocation9 + $0x18] sm:$0xff] %v1062_v33   ;;  %v858_v39 = vadd.f32 %v1230_v38, %v1598_v62  ;;  %v812_v40 = vpop.f32.mrb[11].mxu1  ;;  %v873_v42 = vmax.f32 %v857_v34, 0.0 }
 0x21c   :  { %1085 = vst [vmem:[#allocation9 + $0x10] sm:$0xff] %v1057_v36   ;;  %v856_v41 = vadd.f32 %v1598_v62, %v812_v40  ;;  %v871_v44 = vmax.f32 %v855_v37, 0.0 }
 0x21d   :  { %v874_v43 = vmax.f32 %v858_v39, 0.0 }
 0x21e   :  { %v872_v45 = vmax.f32 %v856_v41, 0.0 }
 0x21f   :  { %v1072_v46 = vpack.c.bf16 %v874_v43, %v873_v42 }
 0x220   :  { %v1067_v47 = vpack.c.bf16 %v872_v45, %v871_v44  ;;  %v1233_v48 = vpop.f32.mrb[12].mxu1 }
 0x221   :  { %1088 = vst [vmem:[#allocation9 + $0x28] sm:$0xff] %v1072_v46   ;;  %v861_v49 = vadd.f32 %v1233_v48, %v1598_v62  ;;  %v825_v50 = vpop.f32.mrb[13].mxu1 }
 0x222   :  { %1087 = vst [vmem:[#allocation9 + $0x20] sm:$0xff] %v1067_v47   ;;  %v859_v51 = vadd.f32 %v1598_v62, %v825_v50  ;;  %v1234_v52 = vpop.f32.mrb[14].mxu1 }
 0x223   :  { %v862_v53 = vadd.f32 %v1234_v52, %v1598_v62  ;;  %v828_v54 = vpop.f32.mrb[15].mxu1  ;;  %v877_v56 = vmax.f32 %v861_v49, 0.0 }
 0x224   :  { %v860_v55 = vadd.f32 %v1598_v62, %v828_v54  ;;  %v875_v58 = vmax.f32 %v859_v51, 0.0 }
 0x225   :  { %v878_v57 = vmax.f32 %v862_v53, 0.0 }
 0x226   :  { %v876_v59 = vmax.f32 %v860_v55, 0.0 }
 0x227   :  { %v1082_v60 = vpack.c.bf16 %v878_v57, %v877_v56 }
 0x228   :  { %v1077_v61 = vpack.c.bf16 %v876_v59, %v875_v58 }
 0x229   :  { %1090 = vst [vmem:[#allocation9 + $0x38] sm:$0xff] %v1082_v60  }
 0x22a   :  { %1089 = vst [vmem:[#allocation9 + $0x30] sm:$0xff] %v1077_v61  }
 0x22b   :  { %1387 = shalt.err (!%p1384_p0)
}
 0x22c   :  { %s1388_s13 = scalar_lea.hbm %s1638_s7, 1024 }
 0x22d   :  { %p1389_p1 = scmp.ne.s32.totalorder %s1638_s7, %s1388_s13  ;;  %p1392_p2 = scmp.lt.u32.totalorder %s1388_s13, %s1638_s7 }
 0x22f   :  { %p1394_p3 = pnand %p1392_p2, %p1389_p1 }
 0x231   :  { %1397 = shalt.err (!%p1394_p3)
}
 0x232   :  { %970 = dma.vmem_to_hbm [thread:$0]  %s965_s30, 1024, %s1638_s7, [#allocation5], %s1405_s11, %s1405_s11, %s1406_s12  }
 0x233   :  { %1402 = dma.done.wait [#allocation5], 1024  }
 0x234   :  { %1403 = vsyncadd [#allocation5], 4294966272 }
 0x235   :  { %974 = vsyncpa [#allocation4], 1 }
 0x236   :  { %975 = vsyncpa [#allocation7], 1 }
 0x237   :  { %976 = vsyncpa [#allocation5], 1 }

</bundles_post_ra>
